<compile_context>
chip_gen: v5e
topology: v5e:2x2
jax: 0.10.0
libtpu: 0.0.40
codegen_flags: <defaults>
</compile_context>

<pallas_src>
import functools
import math

import jax
import jax.numpy as jnp
from jax.experimental import pallas as pl
from jax.experimental.pallas import tpu as pltpu

EMB_DIM = 32            # fd
HEADS = 4               # hs
D = EMB_DIM * HEADS     # 128 — lane-aligned
B_TILE_ROWS = 2048      # target rows (= bt*ne) per grid step


def _attention_kernel(x_ref, wqkv_ref, bqkv_ref, o_ref, *, heads, fd, ne):
    rows, d = x_ref.shape                                   # static block shape
    bt = rows // ne
    x = x_ref[...]                                          # bf16 (rows, 128)

    # Single fused QKV projection (one MXU matmul, stationary LHS), f32 accumulation.
    qkv = jnp.dot(x, wqkv_ref[...], preferred_element_type=jnp.float32) + bqkv_ref[0]

    # Per-head q/k/v stacked along the LEADING axis -> one batched einsum and one
    # softmax covering all heads.  Slices are lane slices of the f32 slab; the reshape
    # (rows, fd) -> (bt, ne, fd) splits the major (sublane) axis only.
    def split_heads(base):
        return jnp.concatenate(
            [qkv[:, base + h * fd: base + (h + 1) * fd]
                 .reshape(bt, ne, fd).astype(jnp.bfloat16)
             for h in range(heads)],
            axis=0)                                         # (heads*bt, ne, fd)

    qs = split_heads(0)          # 1/sqrt(fd) already folded into Wq/bq
    ks = split_heads(d)
    vs = split_heads(2 * d)

    # Batched QK^T over (heads*batch); contraction on the last dims (no k transpose).
    s = jnp.einsum("bqd,bkd->bqk", qs, ks,
                   preferred_element_type=jnp.float32)      # (heads*bt, ne, ne)

    # softmax over the last axis, in f32
    s_max = jnp.max(s, axis=-1, keepdims=True)
    p = jnp.exp(s - s_max)
    inv = pl.reciprocal(jnp.sum(p, axis=-1, keepdims=True), approx=True)
    p = (p * inv).astype(jnp.bfloat16)

    o = jnp.einsum("bqk,bkd->bqd", p, vs,
                   preferred_element_type=jnp.float32)      # (heads*bt, ne, fd)

    # Back to the module's (.., heads*fd) lane layout; one lane-dense 128-wide store.
    out = jnp.concatenate([o[h * bt:(h + 1) * bt] for h in range(heads)], axis=-1)
    o_ref[...] = out.reshape(rows, d).astype(o_ref.dtype)


def _prep_fused_qkv(params, fd):
    """Fold the 1/sqrt(fd) score scale into Wq/bq and fuse Q|K|V weights/biases."""
    scale = 1.0 / math.sqrt(float(fd))
    wqkv = jnp.concatenate(
        [params["wq"] * scale, params["wk"], params["wv"]], axis=1).astype(jnp.bfloat16)
    bqkv = jnp.concatenate(
        [params["bq"] * scale, params["bk"], params["bv"]], axis=1).astype(jnp.float32)
    return wqkv, bqkv


def _choose_bt(bs, ne, target_rows=B_TILE_ROWS):
    """Batch elements per grid step.  Small problems -> one grid step (no degenerate
    tiles); large problems -> ~target_rows rows/step, keeping bt*ne 16-row aligned so
    blocks satisfy sublane tiling even with a bf16 input."""
    if bs * ne <= target_rows:
        return bs
    bt = max(1, target_rows // ne)
    align = 16 // math.gcd(ne, 16)
    bt = max(align, (bt // align) * align)
    if (bt * ne) % 16 != 0:        # pathological ne: fall back to a single tile
        return bs
    return min(bt, bs)


def _attention_rows(x2d, wqkv, bqkv, *, ne, heads, fd, out_dtype):
    """Attention over row-flattened features x2d: (bs*ne, heads*fd) -> same shape."""
    rows, d = x2d.shape
    assert rows % ne == 0 and d == heads * fd
    bs = rows // ne

    bt = _choose_bt(bs, ne)
    pad_b = (-bs) % bt
    if pad_b:
        x2d = jnp.pad(x2d, ((0, pad_b * ne), (0, 0)))
    rows_p = (bs + pad_b) * ne
    tile_rows = bt * ne
    grid = rows_p // tile_rows

    kernel = functools.partial(_attention_kernel, heads=heads, fd=fd, ne=ne)

    out = pl.pallas_call(
        kernel,
        out_shape=jax.ShapeDtypeStruct((rows_p, d), out_dtype),
        grid_spec=pltpu.PrefetchScalarGridSpec(
            num_scalar_prefetch=0,
            grid=(grid,),
            in_specs=[
                pl.BlockSpec((tile_rows, d), lambda i: (i, 0)),   # bf16 feature rows
                pl.BlockSpec((d, 3 * d), lambda i: (0, 0)),       # fused Wqkv (bf16)
                pl.BlockSpec((1, 3 * d), lambda i: (0, 0)),       # fused bias (f32)
            ],
            out_specs=pl.BlockSpec((tile_rows, d), lambda i: (i, 0)),
        ),
        compiler_params=pltpu.CompilerParams(
            dimension_semantics=("parallel",),
            vmem_limit_bytes=32 * 1024 * 1024),
    )(x2d, wqkv, bqkv)

    if pad_b:
        out = out[:rows]
    return out


def self_attention_i(feature, params, *, heads=HEADS, fd=EMB_DIM):
    """Equivalent of SelfAttention.forward_i. feature: (bs, ne, heads*fd)."""
    bs, ne, d = feature.shape
    assert d == heads * fd
    wqkv, bqkv = _prep_fused_qkv(params, fd)
    # bf16 at the HBM boundary (the kernel cast to bf16 immediately anyway).
    x2d = feature.reshape(bs * ne, d).astype(jnp.bfloat16)
    out = _attention_rows(x2d, wqkv, bqkv, ne=ne, heads=heads, fd=fd,
                          out_dtype=feature.dtype)
    return out.reshape(bs, ne, d)


def self_attention_forward(features_list, params, *, heads=HEADS, fd=EMB_DIM):
    """Equivalent of SelfAttention.forward: cat over list, flattened to (-1, hs*fd)."""
    d = heads * fd
    features_list = list(features_list)
    # Fuse all list elements into a single pallas_call when entity counts match
    # (row order of the fused call equals per-element processing + concat).
    if len(features_list) > 1 and len({f.shape[1] for f in features_list}) == 1:
        stacked = jnp.concatenate(features_list, axis=0)
        return self_attention_i(stacked, params, heads=heads, fd=fd).reshape(-1, d)
    outs = [self_attention_i(f, params, heads=heads, fd=fd).reshape(-1, d)
            for f in features_list]
    return jnp.concatenate(outs, axis=0)


def init_params(key, gain=1.0):
    """Parameter init matching the module's shapes: nn.Linear(D, D), orthogonal weight
    (gain), zero bias.  Stored as (in, out) so the kernel computes y = x @ W + b."""
    kq, kk, kv = jax.random.split(key, 3)
    ortho = jax.nn.initializers.orthogonal(scale=gain)
    return {
        "wq": ortho(kq, (D, D), jnp.float32),
        "wk": ortho(kk, (D, D), jnp.float32),
        "wv": ortho(kv, (D, D), jnp.float32),
        "bq": jnp.zeros((1, D), jnp.float32),
        "bk": jnp.zeros((1, D), jnp.float32),
        "bv": jnp.zeros((1, D), jnp.float32),
    }


def _reference_forward_i(feature, params):
    """Pure-JAX f32 reference of forward_i for a correctness sanity check."""
    bs, ne, d = feature.shape
    hs, fd = HEADS, EMB_DIM
    q = feature @ params["wq"] + params["bq"][0]
    k = feature @ params["wk"] + params["bk"][0]
    v = feature @ params["wv"] + params["bv"][0]
    q = q.reshape(bs, ne, hs, fd).transpose(0, 2, 1, 3)
    k = k.reshape(bs, ne, hs, fd).transpose(0, 2, 1, 3)
    v = v.reshape(bs, ne, hs, fd).transpose(0, 2, 1, 3)
    dot = jax.nn.softmax(jnp.einsum("bhqd,bhkd->bhqk", q, k) / math.sqrt(fd), axis=-1)
    out = jnp.einsum("bhqk,bhkd->bhqd", dot, v)
    return out.transpose(0, 2, 1, 3).reshape(bs, ne, hs * fd)


# TODO(synk): forward_a / forward_4_adaptive_semantics are not implemented; only the
# module's forward()/forward_i() path (the spec's hot path) is translated.

if __name__ == "__main__":
    key = jax.random.PRNGKey(0)
    kp, k1, k2 = jax.random.split(key, 3)

    params = init_params(kp, gain=1.0)

    bs, ne = 2, 8
    # `features` in forward() is an iterable of tensors; use a list of 2 arrays.
    features = [
        jax.random.normal(k1, (bs, ne, D), jnp.float32),
        jax.random.normal(k2, (bs, ne, D), jnp.float32),
    ]

    out = self_attention_forward(features, params)
    out = jax.block_until_ready(out)

    # Sanity check vs pure-JAX f32 reference (kernel matmuls run in bf16 with f32
    # accumulation and approx softmax reciprocal, so tolerance is loosened).
    ref = jnp.concatenate(
        [_reference_forward_i(f, params).reshape(-1, D) for f in features], axis=0)
    assert out.shape == (2 * bs * ne, D)
    assert jnp.allclose(out, ref, atol=5e-2, rtol=5e-2), "mismatch vs reference"

    print("KERNEL_OK")
</pallas_src>

<mosaic_0001>
module attributes {stable_mosaic.version = 11 : i64} {
  func.func @_attention_kernel(%arg0: i32, %arg1: memref<32x128xbf16, #tpu.memory_space<vmem>>, %arg2: memref<128x384xbf16, #tpu.memory_space<vmem>>, %arg3: memref<1x384xf32, #tpu.memory_space<vmem>>, %arg4: memref<32x128xf32, #tpu.memory_space<vmem>>) attributes {dimension_semantics = [#tpu.dimension_semantics<parallel>], iteration_bounds = array<i64: 1>, scalar_prefetch = 0 : i64, scratch_operands = 0 : i64, tpu.core_type = #tpu.core_type<tc>, window_params = [{transform_indices = @transform_0, window_bounds = array<i64: 32, 128>}, {pipeline_mode = #tpu.pipeline_mode<synchronous>, transform_indices = @transform_1, window_bounds = array<i64: 128, 384>}, {pipeline_mode = #tpu.pipeline_mode<synchronous>, transform_indices = @transform_2, window_bounds = array<i64: 1, 384>}, {transform_indices = @transform_3, window_bounds = array<i64: 32, 128>}]} {
    %c0 = arith.constant 0 : index
    %c0_0 = arith.constant 0 : index
    %0 = vector.load %arg1[%c0, %c0_0] : memref<32x128xbf16, #tpu.memory_space<vmem>>, vector<32x128xbf16>
    %c0_1 = arith.constant 0 : index
    %c0_2 = arith.constant 0 : index
    %1 = vector.load %arg2[%c0_1, %c0_2] : memref<128x384xbf16, #tpu.memory_space<vmem>>, vector<128x384xbf16>
    %cst = arith.constant dense<0.000000e+00> : vector<32x384xf32>
    %2 = tpu.matmul %0, %1, %cst {dimension_numbers = #tpu.dot_dimension_numbers<[1], [0], [0], [1], [0, 0, 1, 1], [], []>} : vector<32x128xbf16>, vector<128x384xbf16>, vector<32x384xf32> -> vector<32x384xf32>
    %c0_3 = arith.constant 0 : index
    %c0_4 = arith.constant 0 : index
    %3 = vector.load %arg3[%c0_3, %c0_4] : memref<1x384xf32, #tpu.memory_space<vmem>>, vector<1x384xf32>
    %4 = vector.shape_cast %3 : vector<1x384xf32> to vector<384xf32>
    %5 = vector.shape_cast %4 : vector<384xf32> to vector<1x384xf32>
    %6 = vector.broadcast %5 : vector<1x384xf32> to vector<32x384xf32>
    %7 = arith.addf %2, %6 : vector<32x384xf32>
    %8 = vector.extract_strided_slice %7 {offsets = [0, 0], sizes = [32, 32], strides = [1, 1]} : vector<32x384xf32> to vector<32x32xf32>
    %9 = vector.shape_cast %8 : vector<32x32xf32> to vector<4x8x32xf32>
    %10 = arith.truncf %9 : vector<4x8x32xf32> to vector<4x8x32xbf16>
    %11 = vector.extract_strided_slice %7 {offsets = [0, 32], sizes = [32, 32], strides = [1, 1]} : vector<32x384xf32> to vector<32x32xf32>
    %12 = vector.shape_cast %11 : vector<32x32xf32> to vector<4x8x32xf32>
    %13 = arith.truncf %12 : vector<4x8x32xf32> to vector<4x8x32xbf16>
    %14 = vector.extract_strided_slice %7 {offsets = [0, 64], sizes = [32, 32], strides = [1, 1]} : vector<32x384xf32> to vector<32x32xf32>
    %15 = vector.shape_cast %14 : vector<32x32xf32> to vector<4x8x32xf32>
    %16 = arith.truncf %15 : vector<4x8x32xf32> to vector<4x8x32xbf16>
    %17 = vector.extract_strided_slice %7 {offsets = [0, 96], sizes = [32, 32], strides = [1, 1]} : vector<32x384xf32> to vector<32x32xf32>
    %18 = vector.shape_cast %17 : vector<32x32xf32> to vector<4x8x32xf32>
    %19 = arith.truncf %18 : vector<4x8x32xf32> to vector<4x8x32xbf16>
    %20 = tpu.concatenate %10, %13, %16, %19 in 0 : vector<4x8x32xbf16>, vector<4x8x32xbf16>, vector<4x8x32xbf16>, vector<4x8x32xbf16> -> vector<16x8x32xbf16>
    %21 = vector.extract_strided_slice %7 {offsets = [0, 128], sizes = [32, 32], strides = [1, 1]} : vector<32x384xf32> to vector<32x32xf32>
    %22 = vector.shape_cast %21 : vector<32x32xf32> to vector<4x8x32xf32>
    %23 = arith.truncf %22 : vector<4x8x32xf32> to vector<4x8x32xbf16>
    %24 = vector.extract_strided_slice %7 {offsets = [0, 160], sizes = [32, 32], strides = [1, 1]} : vector<32x384xf32> to vector<32x32xf32>
    %25 = vector.shape_cast %24 : vector<32x32xf32> to vector<4x8x32xf32>
    %26 = arith.truncf %25 : vector<4x8x32xf32> to vector<4x8x32xbf16>
    %27 = vector.extract_strided_slice %7 {offsets = [0, 192], sizes = [32, 32], strides = [1, 1]} : vector<32x384xf32> to vector<32x32xf32>
    %28 = vector.shape_cast %27 : vector<32x32xf32> to vector<4x8x32xf32>
    %29 = arith.truncf %28 : vector<4x8x32xf32> to vector<4x8x32xbf16>
    %30 = vector.extract_strided_slice %7 {offsets = [0, 224], sizes = [32, 32], strides = [1, 1]} : vector<32x384xf32> to vector<32x32xf32>
    %31 = vector.shape_cast %30 : vector<32x32xf32> to vector<4x8x32xf32>
    %32 = arith.truncf %31 : vector<4x8x32xf32> to vector<4x8x32xbf16>
    %33 = tpu.concatenate %23, %26, %29, %32 in 0 : vector<4x8x32xbf16>, vector<4x8x32xbf16>, vector<4x8x32xbf16>, vector<4x8x32xbf16> -> vector<16x8x32xbf16>
    %34 = vector.extract_strided_slice %7 {offsets = [0, 256], sizes = [32, 32], strides = [1, 1]} : vector<32x384xf32> to vector<32x32xf32>
    %35 = vector.shape_cast %34 : vector<32x32xf32> to vector<4x8x32xf32>
    %36 = arith.truncf %35 : vector<4x8x32xf32> to vector<4x8x32xbf16>
    %37 = vector.extract_strided_slice %7 {offsets = [0, 288], sizes = [32, 32], strides = [1, 1]} : vector<32x384xf32> to vector<32x32xf32>
    %38 = vector.shape_cast %37 : vector<32x32xf32> to vector<4x8x32xf32>
    %39 = arith.truncf %38 : vector<4x8x32xf32> to vector<4x8x32xbf16>
    %40 = vector.extract_strided_slice %7 {offsets = [0, 320], sizes = [32, 32], strides = [1, 1]} : vector<32x384xf32> to vector<32x32xf32>
    %41 = vector.shape_cast %40 : vector<32x32xf32> to vector<4x8x32xf32>
    %42 = arith.truncf %41 : vector<4x8x32xf32> to vector<4x8x32xbf16>
    %43 = vector.extract_strided_slice %7 {offsets = [0, 352], sizes = [32, 32], strides = [1, 1]} : vector<32x384xf32> to vector<32x32xf32>
    %44 = vector.shape_cast %43 : vector<32x32xf32> to vector<4x8x32xf32>
    %45 = arith.truncf %44 : vector<4x8x32xf32> to vector<4x8x32xbf16>
    %46 = tpu.concatenate %36, %39, %42, %45 in 0 : vector<4x8x32xbf16>, vector<4x8x32xbf16>, vector<4x8x32xbf16>, vector<4x8x32xbf16> -> vector<16x8x32xbf16>
    "tpu.trace_start"() <{level = 10 : i32, message = "bqd,bkd->bqk"}> : () -> ()
    %cst_5 = arith.constant dense<0.000000e+00> : vector<16x8x8xf32>
    %47 = tpu.matmul %20, %33, %cst_5 {dimension_numbers = #tpu.dot_dimension_numbers<[2], [2], [1], [1], [0, 0, 0, 1, 1, 1], [0], [0]>} : vector<16x8x32xbf16>, vector<16x8x32xbf16>, vector<16x8x8xf32> -> vector<16x8x8xf32>
    "tpu.trace_stop"() : () -> ()
    %cst_6 = arith.constant dense<0xFF800000> : vector<16x8xf32>
    %48 = vector.multi_reduction <maximumf>, %47, %cst_6 [2] : vector<16x8x8xf32> to vector<16x8xf32>
    %49 = vector.shape_cast %48 : vector<16x8xf32> to vector<16x8x1xf32>
    %50 = vector.broadcast %49 : vector<16x8x1xf32> to vector<16x8x8xf32>
    %51 = arith.subf %47, %50 : vector<16x8x8xf32>
    %52 = math.exp %51 : vector<16x8x8xf32>
    %cst_7 = arith.constant dense<0.000000e+00> : vector<16x8xf32>
    %53 = vector.multi_reduction <add>, %52, %cst_7 [2] : vector<16x8x8xf32> to vector<16x8xf32>
    %54 = vector.shape_cast %53 : vector<16x8xf32> to vector<16x8x1xf32>
    %55 = tpu.reciprocal %54 {approx = true} : vector<16x8x1xf32> -> vector<16x8x1xf32>
    %56 = vector.broadcast %55 : vector<16x8x1xf32> to vector<16x8x8xf32>
    %57 = arith.mulf %52, %56 : vector<16x8x8xf32>
    %58 = arith.truncf %57 : vector<16x8x8xf32> to vector<16x8x8xbf16>
    "tpu.trace_start"() <{level = 10 : i32, message = "bqk,bkd->bqd"}> : () -> ()
    %cst_8 = arith.constant dense<0.000000e+00> : vector<16x8x32xf32>
    %59 = tpu.matmul %58, %46, %cst_8 {dimension_numbers = #tpu.dot_dimension_numbers<[2], [1], [1], [2], [0, 0, 0, 1, 1, 2], [0], [0]>} : vector<16x8x8xbf16>, vector<16x8x32xbf16>, vector<16x8x32xf32> -> vector<16x8x32xf32>
    "tpu.trace_stop"() : () -> ()
    %60 = vector.extract_strided_slice %59 {offsets = [0, 0, 0], sizes = [4, 8, 32], strides = [1, 1, 1]} : vector<16x8x32xf32> to vector<4x8x32xf32>
    %61 = vector.extract_strided_slice %59 {offsets = [4, 0, 0], sizes = [4, 8, 32], strides = [1, 1, 1]} : vector<16x8x32xf32> to vector<4x8x32xf32>
    %62 = vector.extract_strided_slice %59 {offsets = [8, 0, 0], sizes = [4, 8, 32], strides = [1, 1, 1]} : vector<16x8x32xf32> to vector<4x8x32xf32>
    %63 = vector.extract_strided_slice %59 {offsets = [12, 0, 0], sizes = [4, 8, 32], strides = [1, 1, 1]} : vector<16x8x32xf32> to vector<4x8x32xf32>
    %64 = tpu.concatenate %60, %61, %62, %63 in 2 : vector<4x8x32xf32>, vector<4x8x32xf32>, vector<4x8x32xf32>, vector<4x8x32xf32> -> vector<4x8x128xf32>
    %65 = vector.shape_cast %64 : vector<4x8x128xf32> to vector<32x128xf32>
    %c0_9 = arith.constant 0 : index
    %c0_10 = arith.constant 0 : index
    %66 = vector.load %arg4[%c0_9, %c0_10] : memref<32x128xf32, #tpu.memory_space<vmem>>, vector<32x128xf32>
    tpu.vector_store %arg4[%c0_9, %c0_10], %65 {strides = array<i32>} : memref<32x128xf32, #tpu.memory_space<vmem>>, vector<32x128xf32>,
    return
  }
  func.func @transform_0(%arg0: i32) -> (i32, i32) {
    %c0_i32 = arith.constant 0 : i32
    %c0_i32_0 = arith.constant 0 : i32
    return %arg0, %c0_i32 : i32, i32
  }
  func.func @transform_1(%arg0: i32) -> (i32, i32) {
    %c0_i32 = arith.constant 0 : i32
    %c0_i32_0 = arith.constant 0 : i32
    %c0_i32_1 = arith.constant 0 : i32
    return %c0_i32, %c0_i32_0 : i32, i32
  }
  func.func @transform_2(%arg0: i32) -> (i32, i32) {
    %c0_i32 = arith.constant 0 : i32
    %c0_i32_0 = arith.constant 0 : i32
    %c0_i32_1 = arith.constant 0 : i32
    return %c0_i32, %c0_i32_0 : i32, i32
  }
  func.func @transform_3(%arg0: i32) -> (i32, i32) {
    %c0_i32 = arith.constant 0 : i32
    %c0_i32_0 = arith.constant 0 : i32
    return %arg0, %c0_i32 : i32, i32
  }
}

</mosaic_0001>

<bundles_post_ra>
// kernel: tpu_custom_call.1
= control target key start
LH: loop header
LB: loop body
LE: loop exit
PB: predicated region body
PF: predicated region fallthrough
CT: control target
= control target key end

     0   :  { %8 = vsyncpa [#allocation3], 0  ;;  %s2005_s0 = inlined_call_operand.hbm [shape: bf16[32,128], index: 0, kind: input, shape index: {}]   ;;  %s2006_s1 = inlined_call_operand.hbm [shape: bf16[128,384], index: 1, kind: input, shape index: {}]   ;;  %s2007_s2 = inlined_call_operand.hbm [shape: f32[1,384], index: 2, kind: input, shape index: {}]   ;;  %s2008_s3 = inlined_call_operand.hbm [shape: f32[32,128], index: 3, kind: output, shape index: {}]  }
   0x1   :  { %9 = vsyncpa [#allocation6], 0  ;;  %s28_s14 = sshll.u32 %s2006_s1, 4  ;;  %s29_s14 = int_to_ptr.hbm [resolvable:$true] %s28_s14 }
   0x2   :  { %10 = vsyncpa [#allocation4], 0  ;;  %s1627_s15 = smov [#allocation5]   ;;  %s15_s19 = sshll.u32 %s2005_s0, 4  ;;  %s16_s19 = int_to_ptr.hbm [resolvable:$true] %s15_s19 }
   0x3   :  { %s30_s16 = sshll.u32 %s1627_s15, 4  ;;  %s1628_s20 = smov 192   ;;  %s31_s16 = int_to_ptr.vmem [resolvable:$true] %s30_s16 }
   0x4   :  { %s1629_s21 = smov 12   ;;  %s1630_s22 = smov [#allocation2]  }
   0x5   :  { %36 = dma.hbm_to_vmem [thread:$0]  %s29_s14, 3072, %s31_s16, [#allocation6], %s1628_s20, %s1628_s20, %s1629_s21  }
   0x6   :  { %s17_s23 = sshll.u32 %s1630_s22, 4  ;;  %s1631_s24 = smov 64   ;;  %s18_s23 = int_to_ptr.vmem [resolvable:$true] %s17_s23 }
   0x7   :  { %s1632_s25 = smov 4   ;;  %s42_s27 = sshll.u32 %s2007_s2, 4  ;;  %s43_s27 = int_to_ptr.hbm [resolvable:$true] %s42_s27 }
   0x8   :  { %23 = dma.hbm_to_vmem [thread:$0]  %s16_s19, 256, %s18_s23, [#allocation3], %s1631_s24, %s1631_s24, %s1632_s25  }
   0x9   :  { %s1633_s28 = smov [#allocation7]  }
   0xa   :  { %s44_s29 = sshll.u32 %s1633_s28, 4  ;;  %s45_s29 = int_to_ptr.vmem [resolvable:$true] %s44_s29 }
   0xb   :  { %47 = dma.hbm_to_vmem [thread:$0]  %s43_s27, 48, %s45_s29, [#allocation6]  }
   0xc   :  { %1621 = dma.done.wait [#allocation3], 256  }
   0xd   :  { %1622 = vsyncadd [#allocation3], 4294967040 }
   0xe   :  { %1623 = dma.done.wait [#allocation6], 3120  }
   0xf   :  { %1624 = vsyncadd [#allocation6], 4294964176  ;;  %v1381_v0 = vld [vmem:[#allocation5 + $0xa8] sm:$0xf]  ;;  %v1447_v1 = vld [vmem:[#allocation5 + $0xb0] sm:$0xf0] }
  0x10   :  { %v1446_v2 = vld [vmem:[#allocation5 + $0xac] sm:$0xf]  ;;  %v1382_v3 = vor.u32 %v1447_v1, %v1381_v0  ;;  %v1383_v4 = vld [vmem:[#allocation5 + $0xb4] sm:$0xf0]  ;;  %v1369_v5 = vld [vmem:[#allocation5 + $0x90] sm:$0xf] }
  0x11   :  { %v1444_v6 = vld [vmem:[#allocation5 + $0x98] sm:$0xf0]  ;;  %v1386_v7 = vor.u32 %v1446_v2, %v1383_v4  ;;  %v1443_v8 = vld [vmem:[#allocation5 + $0x94] sm:$0xf]  ;;  %v1371_v9 = vld [vmem:[#allocation5 + $0x9c] sm:$0xf0] }
  0x12   :  { %245 = vmatpush.bf16.msra.mxu0 %v1382_v3  ;;  %v1370_v10 = vor.u32 %v1444_v6, %v1369_v5  ;;  %v1374_v11 = vor.u32 %v1443_v8, %v1371_v9  ;;  %v1357_v12 = vld [vmem:[#allocation5 + $0x78] sm:$0xf]  ;;  %v1441_v13 = vld [vmem:[#allocation5 + $0x80] sm:$0xf0]  ;;  %v1440_v14 = vld [vmem:[#allocation5 + $0x7c] sm:$0xf] }
  0x13   :  { %264 = vmatpush.bf16.msra.mxu1 %v1386_v7  ;;  %v1359_v15 = vld [vmem:[#allocation5 + $0x84] sm:$0xf0]  ;;  %v1358_v16 = vor.u32 %v1441_v13, %v1357_v12  ;;  %v1345_v18 = vld [vmem:[#allocation5 + $0x60] sm:$0xf]  ;;  %v1438_v19 = vld [vmem:[#allocation5 + $0x68] sm:$0xf0] }
  0x14   :  { %v1362_v17 = vor.u32 %v1440_v14, %v1359_v15  ;;  %v1437_v20 = vld [vmem:[#allocation5 + $0x64] sm:$0xf]  ;;  %v1347_v21 = vld [vmem:[#allocation5 + $0x6c] sm:$0xf0]  ;;  %v1346_v22 = vor.u32 %v1438_v19, %v1345_v18  ;;  %v1333_v24 = vld [vmem:[#allocation5 + $0x48] sm:$0xf] }
  0x15   :  { %v1350_v23 = vor.u32 %v1437_v20, %v1347_v21  ;;  %v1435_v25 = vld [vmem:[#allocation5 + $0x50] sm:$0xf0]  ;;  %v1434_v26 = vld [vmem:[#allocation5 + $0x4c] sm:$0xf]  ;;  %v1335_v27 = vld [vmem:[#allocation5 + $0x54] sm:$0xf0] }
  0x16   :  { %246 = vmatpush.bf16.msra.mxu0 %v1370_v10  ;;  %v1334_v28 = vor.u32 %v1435_v25, %v1333_v24  ;;  %v1338_v29 = vor.u32 %v1434_v26, %v1335_v27  ;;  %v1321_v30 = vld [vmem:[#allocation5 + $0x30] sm:$0xf]  ;;  %v1432_v31 = vld [vmem:[#allocation5 + $0x38] sm:$0xf0]  ;;  %v1431_v32 = vld [vmem:[#allocation5 + $0x34] sm:$0xf] }
  0x17   :  { %265 = vmatpush.bf16.msra.mxu1 %v1374_v11  ;;  %v1323_v33 = vld [vmem:[#allocation5 + $0x3c] sm:$0xf0]  ;;  %v1322_v34 = vor.u32 %v1432_v31, %v1321_v30  ;;  %v1389_v35 = vld [vmem:[#allocation5 + $0xb0] sm:$0xf]  ;;  %v1448_v36 = vld [vmem:[#allocation5 + $0xb8] sm:$0xf0] }
  0x18   :  { %v1377_v37 = vld [vmem:[#allocation5 + $0x98] sm:$0xf]  ;;  %v1326_v38 = vor.u32 %v1431_v32, %v1323_v33  ;;  %v1429_v40 = vld [vmem:[#allocation5 + $0x20] sm:$0xf0]  ;;  %v1390_v41 = vor.u32 %v1448_v36, %v1389_v35  ;;  %v1428_v43 = vld [vmem:[#allocation5 + $0x1c] sm:$0xf] }
  0x19   :  { %v1309_v39 = vld [vmem:[#allocation5 + $0x18] sm:$0xf]  ;;  %v1445_v42 = vld [vmem:[#allocation5 + $0xa0] sm:$0xf0]  ;;  %v1311_v44 = vld [vmem:[#allocation5 + $0x24] sm:$0xf0] }
  0x1a   :  { %247 = vmatpush.bf16.msra.mxu0 %v1358_v16  ;;  %283 = vmatpush.bf16.msra.mxu2 %v1390_v41  ;;  %v1378_v45 = vor.u32 %v1445_v42, %v1377_v37  ;;  %v1310_v46 = vor.u32 %v1429_v40, %v1309_v39  ;;  %v1365_v47 = vld [vmem:[#allocation5 + $0x80] sm:$0xf]  ;;  %v1442_v48 = vld [vmem:[#allocation5 + $0x88] sm:$0xf0]  ;;  %v1314_v49 = vor.u32 %v1428_v43, %v1311_v44  ;;  %v1425_v52 = vld [vmem:[#allocation5 + $0x4] sm:$0xf] }
  0x1b   :  { %266 = vmatpush.bf16.msra.mxu1 %v1362_v17  ;;  %v1297_v50 = vld [vmem:[#allocation5] sm:$0xf]  ;;  %v1426_v51 = vld [vmem:[#allocation5 + $0x8] sm:$0xf0]  ;;  %v1299_v53 = vld [vmem:[#allocation5 + $0xc] sm:$0xf0]  ;;  %v1366_v54 = vor.u32 %v1442_v48, %v1365_v47 }
  0x1c   :  { %v1298_v55 = vor.u32 %v1426_v51, %v1297_v50  ;;  %v1353_v56 = vld [vmem:[#allocation5 + $0x68] sm:$0xf]  ;;  %v1439_v57 = vld [vmem:[#allocation5 + $0x70] sm:$0xf0]  ;;  %v1302_v58 = vor.u32 %v1425_v52, %v1299_v53  ;;  %v1341_v61 = vld [vmem:[#allocation5 + $0x50] sm:$0xf] }
  0x1d   :  { %v1423_v59 = vld [vmem:[#allocation2] sm:$0xff]  ;;  %v1354_v60 = vor.u32 %v1439_v57, %v1353_v56  ;;  %v1436_v62 = vld [vmem:[#allocation5 + $0x58] sm:$0xf0]  ;;  %v1329_v0 = vld [vmem:[#allocation5 + $0x38] sm:$0xf]  ;;  %vm398_vm0 = vcmask 261120  }
  0x1e   :  { %248 = vmatpush.bf16.msra.mxu0 %v1346_v22  ;;  %284 = vmatpush.bf16.msra.mxu2 %v1378_v45  ;;  %v1342_v63 = vor.u32 %v1436_v62, %v1341_v61  ;;  %v1433_v1 = vld [vmem:[#allocation5 + $0x40] sm:$0xf0]  ;;  %v1317_v3 = vld [vmem:[#allocation5 + $0x20] sm:$0xf]  ;;  %v1430_v4 = vld [vmem:[#allocation5 + $0x28] sm:$0xf0] }
  0x1f   :  { %267 = vmatpush.bf16.msra.mxu1 %v1350_v23  ;;  %v1330_v2 = vor.u32 %v1433_v1, %v1329_v0  ;;  %v1318_v5 = vor.u32 %v1430_v4, %v1317_v3  ;;  %v1305_v6 = vld [vmem:[#allocation5 + $0x8] sm:$0xf]  ;;  %v1427_v7 = vld [vmem:[#allocation5 + $0x10] sm:$0xf0]  ;;  %v1424_v8 = vld [vmem:[#allocation2 + $0x8] sm:$0xff]  ;;  %s1634_s0 = smov 96  }
  0x20   :  { %v1306_v9 = vor.u32 %v1427_v7, %v1305_v6  ;;  %v97_v10 = vld [vmem:[#allocation7] sm:$0x7]  ;;  %s1635_s2 = smov 32   ;;  %vm703_vm1 = vcmask 64512   ;;  %vm899_vm2 = vcmask 1043456   ;;  %vm1253_vm3 = vcmask 523264  }
  0x21   :  { %v100_v11 = vperm.slane %v97_v10, 1  ;;  %v99_v15 = vperm.slane %v97_v10, 0  ;;  %v101_v43 = vperm.slane %v97_v10, 2  ;;  %vm1258_vm4 = vcmask 785408   ;;  %s1636_s30 = smov [#allocation8]   ;;  %s1273_s7 = sshll.u32 %s2008_s3, 4  ;;  %s1274_s7 = int_to_ptr.hbm [resolvable:$true] %s1273_s7 }
  0x22   :  { %249 = vmatpush.bf16.msra.mxu0 %v1334_v28  ;;  %285 = vmatpush.bf16.msra.mxu2 %v1366_v54  ;;  %s1271_s4 = sshll.u32 %s1636_s30, 4  ;;  %s1637_s8 = smov 128   ;;  %s1272_s4 = int_to_ptr.vmem [resolvable:$true] %s1271_s4 }
  0x23   :  { %268 = vmatpush.bf16.msra.mxu1 %v1338_v29  ;;  %s1638_s9 = smov 8  }
  0x26   :  { %250 = vmatpush.bf16.msra.mxu0 %v1322_v34  ;;  %286 = vmatpush.bf16.msra.mxu2 %v1354_v60 }
  0x27   :  { %269 = vmatpush.bf16.msra.mxu1 %v1326_v38 }
  0x2a   :  { %251 = vmatpush.bf16.msra.mxu0 %v1310_v46  ;;  %287 = vmatpush.bf16.msra.mxu2 %v1342_v63 }
  0x2b   :  { %270 = vmatpush.bf16.msra.mxu1 %v1314_v49 }
  0x2e   :  { %252 = vmatpush.bf16.msra.mxu0 %v1298_v55  ;;  %288 = vmatpush.bf16.msra.mxu2 %v1330_v2 }
  0x2f   :  { %271 = vmatpush.bf16.msra.mxu1 %v1302_v58 }
  0x31   :  { %253 = vmatmul.bf16.vlgmr.msra.gmra.mxu0 %v1423_v59 }
  0x32   :  { %272 = vmatmul.bf16.vlgmr.msra.gmra.mxu1 %v1423_v59  ;;  %289 = vmatpush.bf16.msra.mxu2 %v1318_v5 }
  0x36   :  { %290 = vmatpush.bf16.msra.mxu2 %v1306_v9 }
  0x39   :  { %291 = vmatmul.bf16.vlgmr.msra.gmra.mxu2 %v1423_v59 }
  0x41   :  { %258 = vmatmul.bf16.gmra.mxu0 %v1424_v8 }
  0x42   :  { %277 = vmatmul.bf16.gmra.mxu1 %v1424_v8 }
  0x49   :  { %296 = vmatmul.bf16.gmra.mxu2 %v1424_v8 }
  0xae   :  { %v254_v12 = vpop.f32.mrf.mxu0 }
  0xaf   :  { %v273_v13 = vpop.f32.mrf.mxu1  ;;  %v255_v18 = vadd.f32 %v254_v12, %v99_v15 }
  0xb0   :  { %v274_v14 = vadd.f32 %v273_v13, %v100_v11 }
  0xb1   :  { %v302_v22 = vpack.c.bf16 %v255_v18, %v255_v18 }
  0xb2   :  { %v334_v16 = vpack.c.bf16 %v274_v14, %v274_v14 }
  0xb4   :  { %342 = vrot.lane.b32.xlu2 %v334_v16, %s1634_s0  ;;  %v403_v17 = vsel %vm398_vm0, %v334_v16, 0 }
  0xb5   :  { %412 = vmatpush.bf16.xpose.msra.mxu3 %v403_v17 }
  0xb6   :  { %v256_v19 = vpop.f32.mrf.mxu0 }
  0xb7   :  { %v275_v20 = vpop.f32.mrf.mxu1  ;;  %v257_v33 = vadd.f32 %v256_v19, %v99_v15 }
  0xb8   :  { %v276_v21 = vadd.f32 %v275_v20, %v100_v11 }
  0xb9   :  { %v303_v39 = vpack.c.bf16 %v257_v33, %v257_v33 }
  0xba   :  { %v335_v23 = vpack.c.bf16 %v276_v21, %v276_v21 }
  0xbc   :  { %344 = vrot.lane.b32.xlu2 %v335_v23, %s1634_s0  ;;  %1391 = vmatmul.msk.bf16.vlgmr.msra.gmra.mxu3 %vm398_vm0, %v302_v22  ;;  %v422_v24 = vsel %vm398_vm0, %v335_v23, 0  ;;  %v292_v41 = vpop.f32.mrf.mxu2 }
  0xbd   :  { %431 = vmatpush.bf16.xpose.msrb.mxu3 %v422_v24  ;;  %v293_v47 = vadd.f32 %v292_v41, %v101_v43 }
  0xbe   :  { %v259_v25 = vpop.f32.mrf.mxu0 }
  0xbf   :  { %v260_v26 = vadd.f32 %v259_v25, %v99_v15  ;;  %v278_v27 = vpop.f32.mrf.mxu1  ;;  %v1704_v48 = vpack.c.bf16 %v293_v47, %v293_v47 }
  0xc0   :  { %v279_v28 = vadd.f32 %v278_v27, %v100_v11 }
  0xc1   :  { %v304_v29 = vpack.c.bf16 %v260_v26, %v260_v26 }
  0xc2   :  { %v336_v30 = vpack.c.bf16 %v279_v28, %v279_v28  ;;  %v901_v28 = vsel %vm899_vm2, %v1704_v48, 0 }
  0xc3   :  { %314 = vrot.lane.b32.xlu1 %v304_v29, %s1634_s0 }
  0xc4   :  { %346 = vrot.lane.b32.xlu0 %v336_v30, %s1634_s0  ;;  %310 = vrot.lane.b32.xlu2 %v302_v22, %s1634_s0  ;;  %v441_v31 = vsel %vm398_vm0, %v336_v30, 0  ;;  %v294_v42 = vpop.f32.mrf.mxu2 }
  0xc5   :  { %450 = vmatpush.bf16.xpose.msra.mxu3 %v441_v31  ;;  %v295_v49 = vadd.f32 %v294_v42, %v101_v43 }
  0xc6   :  { %v261_v32 = vpop.f32.mrf.mxu0 }
  0xc7   :  { %v262_v34 = vadd.f32 %v261_v32, %v99_v15  ;;  %v280_v35 = vpop.f32.mrf.mxu1  ;;  %v1710_v50 = vpack.c.bf16 %v295_v49, %v295_v49 }
  0xc8   :  { %v281_v36 = vadd.f32 %v280_v35, %v100_v11 }
  0xc9   :  { %v305_v37 = vpack.c.bf16 %v262_v34, %v262_v34  ;;  %v920_v41 = vsel %vm899_vm2, %v1710_v50, 0 }
  0xca   :  { %v337_v38 = vpack.c.bf16 %v281_v36, %v281_v36 }
  0xcb   :  { %322 = vrot.lane.b32.xlu1 %v304_v29, %s1631_s24 }
  0xcc   :  { %348 = vrot.lane.b32.xlu0 %v337_v38, %s1634_s0  ;;  %324 = vrot.lane.b32.xlu2 %v305_v37, %s1631_s24  ;;  %v460_v40 = vsel %vm398_vm0, %v337_v38, 0  ;;  %v297_v44 = vpop.f32.mrf.mxu2 }
  0xcd   :  { %1392 = vmatmul.msk.bf16.vlgmr.msrb.gmra.mxu3 %vm398_vm0, %v303_v39  ;;  %v298_v45 = vadd.f32 %v297_v44, %v101_v43 }
  0xce   :  { %469 = vmatpush.bf16.xpose.msrb.mxu3 %v460_v40 }
  0xcf   :  { %v1698_v46 = vpack.c.bf16 %v298_v45, %v298_v45 }
  0xd1   :  { %v939_v14 = vsel %vm899_vm2, %v1698_v46, 0 }
  0xd3   :  { %316 = vrot.lane.b32.xlu1 %v305_v37, %s1634_s0 }
  0xd4   :  { %354 = vrot.lane.b32.xlu0 %v336_v30, %s1631_s24  ;;  %362 = vrot.lane.b32.xlu2 %v336_v30, %s1635_s2  ;;  %v299_v51 = vpop.f32.mrf.mxu2 }
  0xd5   :  { %v300_v52 = vadd.f32 %v299_v51, %v101_v43 }
  0xd7   :  { %v1721_v55 = vpack.c.bf16 %v300_v52, %v300_v52 }
  0xd9   :  { %v958_v30 = vsel %vm899_vm2, %v1721_v55, 0 }
  0xdb   :  { %356 = vrot.lane.b32.xlu1 %v337_v38, %s1631_s24 }
  0xdc   :  { %312 = vrot.lane.b32.xlu0 %v303_v39, %s1634_s0  ;;  %320 = vrot.lane.b32.xlu2 %v303_v39, %s1631_s24 }
  0xdd   :  { %1393 = vmatmul.msk.bf16.vlgmr.msra.gmra.mxu3 %vm398_vm0, %v304_v29 }
  0xe3   :  { %352 = vrot.lane.b32.xlu1 %v335_v23, %s1631_s24 }
  0xe4   :  { %350 = vrot.lane.b32.xlu0 %v334_v16, %s1631_s24  ;;  %358 = vrot.lane.b32.xlu2 %v334_v16, %s1635_s2 }
  0xeb   :  { %318 = vrot.lane.b32.xlu1 %v302_v22, %s1631_s24 }
  0xec   :  { %364 = vrot.lane.b32.xlu0 %v337_v38, %s1635_s2  ;;  %328 = vrot.lane.b32.xlu2 %v303_v39, %s1635_s2 }
  0xed   :  { %1394 = vmatmul.msk.bf16.vlgmr.msrb.gmra.mxu3 %vm398_vm0, %v305_v37 }
  0xf3   :  { %332 = vrot.lane.b32.xlu1 %v305_v37, %s1635_s2 }
  0xf4   :  { %330 = vrot.lane.b32.xlu0 %v304_v29, %s1635_s2  ;;  %378 = vrot.lane.b32.xlu2 %v1698_v46, %s1634_s0 }
  0xfb   :  { %326 = vrot.lane.b32.xlu1 %v302_v22, %s1635_s2 }
  0xfc   :  { %360 = vrot.lane.b32.xlu0 %v335_v23, %s1635_s2  ;;  %382 = vrot.lane.b32.xlu2 %v1704_v48, %s1631_s24 }
 0x103   :  { %374 = vrot.lane.b32.xlu1 %v1704_v48, %s1634_s0 }
 0x104   :  { %376 = vrot.lane.b32.xlu0 %v1710_v50, %s1634_s0 }
 0x10b   :  { %386 = vrot.lane.b32.xlu1 %v1698_v46, %s1631_s24 }
 0x10c   :  { %384 = vrot.lane.b32.xlu0 %v1710_v50, %s1631_s24 }
 0x10e   :  { %v343_v53 = vpop.permute.xlu2 %342 }
 0x10f   :  { %v479_v54 = vsel %vm398_vm0, %v343_v53, 0 }
 0x110   :  { %488 = vmatpush.bf16.xpose.msrb.mxu0 %v479_v54 }
 0x114   :  { %380 = vrot.lane.b32.xlu0 %v1721_v55, %s1634_s0 }
 0x116   :  { %v345_v56 = vpop.permute.xlu2 %344 }
 0x117   :  { %v498_v57 = vsel %vm398_vm0, %v345_v56, 0 }
 0x118   :  { %507 = vmatpush.bf16.xpose.msrb.mxu1 %v498_v57 }
 0x11c   :  { %388 = vrot.lane.b32.xlu0 %v1721_v55, %s1631_s24 }
 0x11e   :  { %v311_v58 = vpop.permute.xlu2 %310 }
 0x11f   :  { %1395 = vmatmul.msk.bf16.vlgmr.msrb.gmra.mxu0 %vm398_vm0, %v311_v58 }
 0x126   :  { %v325_v59 = vpop.permute.xlu2 %324 }
 0x12e   :  { %v363_v0 = vpop.permute.xlu2 %362 }
 0x12f   :  { %v669_v9 = vsel %vm398_vm0, %v363_v0, 0 }
 0x135   :  { %v315_v60 = vpop.permute.xlu1 %314 }
 0x136   :  { %v347_v61 = vpop.permute.xlu0 %346  ;;  %v321_v10 = vpop.permute.xlu2 %320 }
 0x137   :  { %v517_v62 = vsel %vm398_vm0, %v347_v61, 0 }
 0x138   :  { %526 = vmatpush.bf16.xpose.msrb.mxu2 %v517_v62 }
 0x13d   :  { %v323_v63 = vpop.permute.xlu1 %322 }
 0x13e   :  { %v349_v1 = vpop.permute.xlu0 %348  ;;  %v359_v17 = vpop.permute.xlu2 %358 }
 0x13f   :  { %v536_v2 = vsel %vm398_vm0, %v349_v1, 0  ;;  %v1731_v3 = vpop.f32.mrf.mxu3  ;;  %1397 = vmatmul.msk.bf16.vlgmr.msrb.gmra.mxu2 %vm398_vm0, %v315_v60  ;;  %v631_v22 = vsel %vm398_vm0, %v359_v17, 0 }
 0x140   :  { %545 = vmatpush.bf16.xpose.msra.mxu3 %v536_v2  ;;  %v704_v4 = vsel %vm703_vm1, %v1731_v3, -inf }
 0x141   :  { %705 = vmax.xlane.f32.xlu2 %v704_v4 }
 0x145   :  { %v317_v5 = vpop.permute.xlu1 %316 }
 0x146   :  { %v355_v6 = vpop.permute.xlu0 %354  ;;  %v329_v24 = vpop.permute.xlu2 %328 }
 0x147   :  { %v593_v7 = vsel %vm398_vm0, %v355_v6, 0  ;;  %v416_v8 = vpop.f32.mrf.mxu3  ;;  %1398 = vmatmul.msk.bf16.vlgmr.msra.gmra.mxu3 %vm398_vm0, %v317_v5 }
 0x148   :  { %602 = vmatpush.bf16.xpose.msra.mxu2 %v593_v7 }
 0x14d   :  { %v357_v11 = vpop.permute.xlu1 %356 }
 0x14e   :  { %v612_v12 = vsel %vm398_vm0, %v357_v11, 0  ;;  %v313_v13 = vpop.permute.xlu0 %312  ;;  %v379_v32 = vpop.permute.xlu2 %378 }
 0x14f   :  { %1396 = vmatmul.msk.bf16.vlgmr.msrb.gmra.mxu1 %vm398_vm0, %v313_v13  ;;  %1401 = vmatmul.msk.bf16.vlgmr.msra.gmra.mxu2 %vm398_vm0, %v323_v63  ;;  %v1015_v34 = vsel %vm899_vm2, %v379_v32, 0 }
 0x150   :  { %678 = vmatpush.bf16.xpose.msrb.mxu2 %v669_v9  ;;  %v1744_v15 = vpop.f32.mrf.mxu3  ;;  %621 = vmatpush.bf16.xpose.msrb.mxu3 %v612_v12 }
 0x151   :  { %v707_v16 = vsel %vm703_vm1, %v1744_v15, -inf }
 0x152   :  { %708 = vmax.xlane.f32.xlu2 %v707_v16 }
 0x155   :  { %v353_v18 = vpop.permute.xlu1 %352 }
 0x156   :  { %v574_v19 = vsel %vm398_vm0, %v353_v18, 0  ;;  %v351_v20 = vpop.permute.xlu0 %350  ;;  %v1784_v58 = vpop.permute.xlu2 %382 }
 0x157   :  { %v555_v21 = vsel %vm398_vm0, %v351_v20, 0  ;;  %1402 = vmatmul.msk.bf16.vlgmr.msrb.gmra.mxu3 %vm398_vm0, %v325_v59  ;;  %583 = vmatpush.bf16.xpose.msra.mxu1 %v574_v19 }
 0x158   :  { %948 = vmatpush.bf16.msra.mxu2 %v939_v14  ;;  %v435_v23 = vpop.f32.mrf.mxu3  ;;  %564 = vmatpush.bf16.xpose.msra.mxu0 %v555_v21 }
 0x15d   :  { %v319_v25 = vpop.permute.xlu1 %318 }
 0x15e   :  { %v365_v26 = vpop.permute.xlu0 %364 }
 0x15f   :  { %v688_v27 = vsel %vm398_vm0, %v365_v26, 0  ;;  %1399 = vmatmul.msk.bf16.vlgmr.msra.gmra.mxu0 %vm398_vm0, %v319_v25  ;;  %1400 = vmatmul.msk.bf16.vlgmr.msra.gmra.mxu1 %vm398_vm0, %v321_v10 }
 0x160   :  { %640 = vmatpush.bf16.xpose.msrb.mxu0 %v631_v22  ;;  %v1757_v29 = vpop.f32.mrf.mxu3  ;;  %697 = vmatpush.bf16.xpose.msra.mxu3 %v688_v27 }
 0x161   :  { %v710_v31 = vsel %vm703_vm1, %v1757_v29, -inf }
 0x162   :  { %711 = vmax.xlane.f32.xlu0 %v710_v31 }
 0x165   :  { %v333_v33 = vpop.permute.xlu1 %332 }
 0x166   :  { %v331_v35 = vpop.permute.xlu0 %330 }
 0x167   :  { %1405 = vmatmul.msk.bf16.vlgmr.msrb.gmra.mxu2 %vm398_vm0, %v331_v35  ;;  %1406 = vmatmul.msk.bf16.vlgmr.msra.gmra.mxu3 %vm398_vm0, %v333_v33 }
 0x168   :  { %910 = vmatpush.bf16.msra.mxu0 %v901_v28  ;;  %967 = vmatpush.bf16.msrb.mxu3 %v958_v30  ;;  %v454_v36 = vpop.f32.mrf.mxu3 }
 0x169   :  { %1024 = vmatpush.bf16.msrb.mxu2 %v1015_v34 }
 0x16d   :  { %v327_v37 = vpop.permute.xlu1 %326 }
 0x16e   :  { %v361_v38 = vpop.permute.xlu0 %360 }
 0x16f   :  { %v650_v39 = vsel %vm398_vm0, %v361_v38, 0  ;;  %1403 = vmatmul.msk.bf16.vlgmr.msrb.gmra.mxu0 %vm398_vm0, %v327_v37 }
 0x170   :  { %v1768_v40 = vpop.f32.mrf.mxu3  ;;  %659 = vmatpush.bf16.xpose.msrb.mxu1 %v650_v39 }
 0x171   :  { %v713_v42 = vsel %vm703_vm1, %v1768_v40, -inf }
 0x172   :  { %714 = vmax.xlane.f32.xlu1 %v713_v42 }
 0x175   :  { %v375_v47 = vpop.permute.xlu1 %374 }
 0x176   :  { %v377_v44 = vpop.permute.xlu0 %376  ;;  %v977_v49 = vsel %vm899_vm2, %v375_v47, 0 }
 0x177   :  { %1404 = vmatmul.msk.bf16.vlgmr.msrb.gmra.mxu1 %vm398_vm0, %v329_v24  ;;  %v996_v45 = vsel %vm899_vm2, %v377_v44, 0  ;;  %986 = vmatpush.bf16.msrb.mxu0 %v977_v49 }
 0x178   :  { %929 = vmatpush.bf16.msra.mxu1 %v920_v41  ;;  %v473_v43 = vpop.f32.mrf.mxu3 }
 0x17c   :  { %1005 = vmatpush.bf16.msrb.mxu1 %v996_v45 }
 0x17d   :  { %v1809_v13 = vpop.permute.xlu1 %386 }
 0x17e   :  { %v1777_v51 = vpop.permute.xlu0 %384 }
 0x186   :  { %v381_v52 = vpop.permute.xlu0 %380 }
 0x187   :  { %v1034_v53 = vsel %vm899_vm2, %v381_v52, 0 }
 0x188   :  { %1043 = vmatpush.bf16.msra.mxu3 %v1034_v53 }
 0x18e   :  { %v1815_v17 = vpop.permute.xlu0 %388 }
 0x19c   :  { %v1780_v54 = vpop.f32.mrf.mxu0 }
 0x19d   :  { %v716_v56 = vsel %vm703_vm1, %v1780_v54, -inf }
 0x19e   :  { %717 = vmax.xlane.f32.xlu2 %v716_v56 }
 0x1a4   :  { %v492_v57 = vpop.f32.mrf.mxu0 }
 0x1b4   :  { %v706_v59 = vpop.xlane.xlu2 %705 }
 0x1b5   :  { %v752_v60 = vsub.f32 %v1731_v3, %v706_v59 }
 0x1b7   :  { %v768_v61 = vmul.f32 1.442695, %v752_v60 }
 0x1b9   :  { %1461 = vpow2.f32 %v768_v61 }
 0x1bf   :  { %v1787_v62 = vpop.eup %1461 }
 0x1c0   :  { %v800_v63 = vsel %vm703_vm1, %v1787_v62, 0.0 }
 0x1c1   :  { %801 = vadd.xlane.f32.xlu2 %v800_v63 }
 0x1c2   :  { %v1791_v0 = vpop.f32.mrf.mxu2 }
 0x1c3   :  { %v722_v24 = vsel %vm703_vm1, %v1791_v0, -inf }
 0x1c5   :  { %v709_v18 = vpop.xlane.xlu2 %708 }
 0x1c6   :  { %v753_v20 = vsub.f32 %v1744_v15, %v709_v18 }
 0x1c8   :  { %v770_v27 = vmul.f32 1.442695, %v753_v20 }
 0x1ca   :  { %v530_v1 = vpop.f32.mrf.mxu2  ;;  %v1793_v2 = vpop.f32.mrf.mxu3 }
 0x1cb   :  { %v725_v25 = vsel %vm703_vm1, %v1793_v2, -inf }
 0x1cc   :  { %v1795_v4 = vpop.f32.mrf.mxu1 }
 0x1cd   :  { %v719_v5 = vsel %vm703_vm1, %v1795_v4, -inf }
 0x1ce   :  { %720 = vmax.xlane.f32.xlu0 %v719_v5 }
 0x1d2   :  { %v549_v3 = vpop.f32.mrf.mxu3  ;;  %v1799_v6 = vpop.f32.mrf.mxu2 }
 0x1d3   :  { %v734_v36 = vsel %vm703_vm1, %v1799_v6, -inf }
 0x1d4   :  { %v511_v7 = vpop.f32.mrf.mxu1 }
 0x1d5   :  { %v712_v30 = vpop.xlane.xlu0 %711  ;;  %v1053_v7 = vsel %vm899_vm2, %v1784_v58, 0 }
 0x1d6   :  { %v754_v33 = vsub.f32 %v1757_v29, %v712_v30 }
 0x1d8   :  { %v772_v38 = vmul.f32 1.442695, %v754_v33 }
 0x1da   :  { %v606_v8 = vpop.f32.mrf.mxu2  ;;  %v1801_v9 = vpop.f32.mrf.mxu3 }
 0x1db   :  { %v737_v10 = vsel %vm703_vm1, %v1801_v9, -inf }
 0x1dc   :  { %v1805_v11 = vpop.f32.mrf.mxu0  ;;  %v1807_v12 = vpop.f32.mrf.mxu1  ;;  %738 = vmax.xlane.f32.xlu2 %v737_v10 }
 0x1dd   :  { %v728_v14 = vsel %vm703_vm1, %v1805_v11, -inf  ;;  %v731_v16 = vsel %vm703_vm1, %v1807_v12, -inf }
 0x1de   :  { %729 = vmax.xlane.f32.xlu0 %v728_v14  ;;  %732 = vmax.xlane.f32.xlu1 %v731_v16 }
 0x1e2   :  { %v625_v19 = vpop.f32.mrf.mxu3 }
 0x1e4   :  { %v568_v21 = vpop.f32.mrf.mxu0  ;;  %v587_v22 = vpop.f32.mrf.mxu1 }
 0x1e5   :  { %v715_v23 = vpop.xlane.xlu1 %714 }
 0x1e6   :  { %v755_v26 = vsub.f32 %v1768_v40, %v715_v23  ;;  %723 = vmax.xlane.f32.xlu0 %v722_v24  ;;  %726 = vmax.xlane.f32.xlu1 %v725_v25 }
 0x1e8   :  { %v774_v28 = vmul.f32 1.442695, %v755_v26 }
 0x1ea   :  { %1463 = vpow2.f32 %v774_v28  ;;  %v1823_v31 = vpop.f32.mrf.mxu2  ;;  %v1825_v15 = vpop.f32.mrf.mxu3 }
 0x1eb   :  { %v746_v32 = vsel %vm703_vm1, %v1823_v31, -inf  ;;  %1465 = vpow2.f32 %v770_v27  ;;  %v749_v53 = vsel %vm703_vm1, %v1825_v15, -inf }
 0x1ec   :  { %v1830_v34 = vpop.f32.mrf.mxu0  ;;  %747 = vmax.xlane.f32.xlu2 %v746_v32  ;;  %1467 = vpow2.f32 %v772_v38 }
 0x1ed   :  { %v740_v35 = vsel %vm703_vm1, %v1830_v34, -inf }
 0x1ee   :  { %741 = vmax.xlane.f32.xlu0 %v740_v35  ;;  %735 = vmax.xlane.f32.xlu1 %v734_v36 }
 0x1f0   :  { %v1836_v37 = vpop.eup %1463 }
 0x1f1   :  { %v1838_v39 = vpop.eup %1465  ;;  %v809_v29 = vsel %vm703_vm1, %v1836_v37, 0.0 }
 0x1f2   :  { %v682_v40 = vpop.f32.mrf.mxu2  ;;  %v701_v41 = vpop.f32.mrf.mxu3  ;;  %v803_v44 = vsel %vm703_vm1, %v1838_v39, 0.0 }
 0x1f3   :  { %v1848_v47 = vpop.eup %1467 }
 0x1f4   :  { %v644_v42 = vpop.f32.mrf.mxu0  ;;  %v1842_v43 = vpop.f32.mrf.mxu1  ;;  %810 = vadd.xlane.f32.xlu2 %v809_v29  ;;  %v806_v52 = vsel %vm703_vm1, %v1848_v47, 0.0 }
 0x1f5   :  { %v743_v45 = vsel %vm703_vm1, %v1842_v43, -inf }
 0x1f6   :  { %804 = vadd.xlane.f32.xlu0 %v803_v44  ;;  %744 = vmax.xlane.f32.xlu1 %v743_v45 }
 0x1fc   :  { %v663_v49 = vpop.f32.mrf.mxu1 }
 0x1fe   :  { %807 = vadd.xlane.f32.xlu1 %v806_v52  ;;  %750 = vmax.xlane.f32.xlu0 %v749_v53 }
 0x211   :  { %v718_v56 = vpop.xlane.xlu2 %717 }
 0x212   :  { %v756_v57 = vsub.f32 %v1780_v54, %v718_v56 }
 0x214   :  { %v776_v59 = vmul.f32 1.442695, %v756_v57 }
 0x216   :  { %1469 = vpow2.f32 %v776_v59 }
 0x21c   :  { %v1855_v60 = vpop.eup %1469 }
 0x21d   :  { %v812_v61 = vsel %vm703_vm1, %v1855_v60, 0.0 }
 0x21e   :  { %813 = vadd.xlane.f32.xlu0 %v812_v61 }
 0x234   :  { %v802_v63 = vpop.xlane.xlu2 %801 }
 0x235   :  { %1471 = vrcp.f32 %v802_v63 }
 0x23b   :  { %v1472_v1 = vpop.eup %1471 }
 0x23c   :  { %v864_v5 = vmul.f32 %v1472_v1, %v1787_v62 }
 0x23e   :  { %v880_v3 = vpack.c.bf16 %v864_v5, %v864_v5 }
 0x240   :  { %1407 = vmatmul.msk.bf16.vlgmr.msra.gmra.mxu0 %vm703_vm1, %v880_v3 }
 0x241   :  { %1062 = vmatpush.bf16.msra.mxu0 %v1053_v7  ;;  %v721_v54 = vpop.xlane.xlu0 %720 }
 0x242   :  { %v757_v8 = vsub.f32 %v1795_v4, %v721_v54 }
 0x244   :  { %v778_v10 = vmul.f32 1.442695, %v757_v8  ;;  %v1110_v8 = vsel %vm899_vm2, %v1815_v17, 0 }
 0x246   :  { %1473 = vpow2.f32 %v778_v10 }
 0x24c   :  { %v1864_v14 = vpop.eup %1473 }
 0x24d   :  { %v815_v16 = vsel %vm703_vm1, %v1864_v14, 0.0 }
 0x24e   :  { %816 = vadd.xlane.f32.xlu1 %v815_v16 }
 0x24f   :  { %v739_v22 = vpop.xlane.xlu2 %738 }
 0x250   :  { %v763_v52 = vsub.f32 %v1801_v9, %v739_v22 }
 0x251   :  { %v730_v18 = vpop.xlane.xlu0 %729  ;;  %v733_v62 = vpop.xlane.xlu1 %732 }
 0x252   :  { %v760_v19 = vsub.f32 %v1805_v11, %v730_v18  ;;  %v761_v58 = vsub.f32 %v1807_v12, %v733_v62  ;;  %v790_v1 = vmul.f32 1.442695, %v763_v52 }
 0x254   :  { %v784_v20 = vmul.f32 1.442695, %v760_v19  ;;  %v786_v21 = vmul.f32 1.442695, %v761_v58 }
 0x256   :  { %1475 = vpow2.f32 %v784_v20 }
 0x257   :  { %1477 = vpow2.f32 %v786_v21 }
 0x259   :  { %v724_v4 = vpop.xlane.xlu0 %723  ;;  %v727_v23 = vpop.xlane.xlu1 %726 }
 0x25a   :  { %v758_v24 = vsub.f32 %v1791_v0, %v724_v4  ;;  %v759_v25 = vsub.f32 %v1793_v2, %v727_v23 }
 0x25c   :  { %v1872_v26 = vpop.eup %1475  ;;  %v780_v27 = vmul.f32 1.442695, %v758_v24  ;;  %v782_v28 = vmul.f32 1.442695, %v759_v25 }
 0x25d   :  { %v1874_v30 = vpop.eup %1477  ;;  %v824_v11 = vsel %vm703_vm1, %v1872_v26, 0.0 }
 0x25e   :  { %1479 = vpow2.f32 %v780_v27  ;;  %v827_v12 = vsel %vm703_vm1, %v1874_v30, 0.0  ;;  %825 = vadd.xlane.f32.xlu0 %v824_v11 }
 0x25f   :  { %1481 = vpow2.f32 %v782_v28  ;;  %828 = vadd.xlane.f32.xlu2 %v827_v12  ;;  %v748_v32 = vpop.xlane.xlu2 %747 }
 0x261   :  { %v742_v0 = vpop.xlane.xlu0 %741  ;;  %v736_v33 = vpop.xlane.xlu1 %735 }
 0x262   :  { %v764_v2 = vsub.f32 %v1830_v34, %v742_v0  ;;  %v762_v35 = vsub.f32 %v1799_v6, %v736_v33 }
 0x264   :  { %v1882_v36 = vpop.eup %1479  ;;  %v792_v38 = vmul.f32 1.442695, %v764_v2  ;;  %v788_v40 = vmul.f32 1.442695, %v762_v35 }
 0x265   :  { %v1884_v41 = vpop.eup %1481  ;;  %v818_v29 = vsel %vm703_vm1, %v1882_v36, 0.0 }
 0x266   :  { %1483 = vpow2.f32 %v792_v38  ;;  %819 = vadd.xlane.f32.xlu1 %v818_v29  ;;  %v821_v42 = vsel %vm703_vm1, %v1884_v41, 0.0 }
 0x267   :  { %1485 = vpow2.f32 %v788_v40  ;;  %822 = vadd.xlane.f32.xlu2 %v821_v42  ;;  %v811_v44 = vpop.xlane.xlu2 %810 }
 0x268   :  { %1487 = vrcp.f32 %v811_v44 }
 0x269   :  { %v805_v34 = vpop.xlane.xlu0 %804  ;;  %v745_v6 = vpop.xlane.xlu1 %744 }
 0x26a   :  { %1489 = vrcp.f32 %v805_v34  ;;  %v765_v45 = vsub.f32 %v1842_v43, %v745_v6 }
 0x26c   :  { %v1891_v49 = vpop.eup %1483  ;;  %v794_v53 = vmul.f32 1.442695, %v765_v45 }
 0x26d   :  { %v1894_v56 = vpop.eup %1485  ;;  %v836_v57 = vsel %vm703_vm1, %v1891_v49, 0.0 }
 0x26e   :  { %v1488_v59 = vpop.eup %1487  ;;  %1491 = vpow2.f32 %v794_v53  ;;  %v830_v61 = vsel %vm703_vm1, %v1894_v56, 0.0  ;;  %837 = vadd.xlane.f32.xlu0 %v836_v57 }
 0x26f   :  { %v867_v63 = vmul.f32 %v1488_v59, %v1836_v37  ;;  %831 = vadd.xlane.f32.xlu2 %v830_v61  ;;  %v766_v37 = vsub.f32 %v1823_v31, %v748_v32 }
 0x270   :  { %v1490_v43 = vpop.eup %1489 }
 0x271   :  { %v883_v5 = vpack.c.bf16 %v867_v63, %v867_v63  ;;  %v865_v9 = vmul.f32 %v1490_v43, %v1838_v39  ;;  %v808_v3 = vpop.xlane.xlu1 %807  ;;  %v751_v7 = vpop.xlane.xlu0 %750  ;;  %v1072_v39 = vsel %vm899_vm2, %v1777_v51, 0  ;;  %v796_v62 = vmul.f32 1.442695, %v766_v37 }
 0x272   :  { %1493 = vrcp.f32 %v808_v3  ;;  %v767_v54 = vsub.f32 %v1825_v15, %v751_v7  ;;  %v1091_v51 = vsel %vm899_vm2, %v1809_v13, 0 }
 0x273   :  { %v881_v10 = vpack.c.bf16 %v865_v9, %v865_v9  ;;  %1410 = vmatmul.msk.bf16.vlgmr.msrb.gmra.mxu3 %vm703_vm1, %v883_v5  ;;  %1495 = vpow2.f32 %v790_v1 }
 0x274   :  { %v1906_v16 = vpop.eup %1491  ;;  %v798_v18 = vmul.f32 1.442695, %v767_v54  ;;  %1119 = vmatpush.bf16.msrb.mxu3 %v1110_v8 }
 0x275   :  { %1408 = vmatmul.msk.bf16.vlgmr.msra.gmra.mxu1 %vm703_vm1, %v881_v10  ;;  %v839_v15 = vsel %vm703_vm1, %v1906_v16, 0.0 }
 0x276   :  { %1497 = vpow2.f32 %v798_v18  ;;  %1081 = vmatpush.bf16.msra.mxu1 %v1072_v39  ;;  %840 = vadd.xlane.f32.xlu1 %v839_v15 }
 0x277   :  { %1499 = vpow2.f32 %v796_v62 }
 0x278   :  { %v1494_v17 = vpop.eup %1493 }
 0x279   :  { %v866_v19 = vmul.f32 %v1494_v17, %v1848_v47  ;;  %v1915_v58 = vpop.eup %1495 }
 0x27a   :  { %v833_v21 = vsel %vm703_vm1, %v1915_v58, 0.0 }
 0x27b   :  { %v882_v31 = vpack.c.bf16 %v866_v19, %v866_v19 }
 0x27c   :  { %v1917_v20 = vpop.eup %1497 }
 0x27d   :  { %1409 = vmatmul.msk.bf16.vlgmr.msra.gmra.mxu2 %vm703_vm1, %v882_v31  ;;  %v845_v22 = vsel %vm703_vm1, %v1917_v20, 0.0  ;;  %v1926_v47 = vpop.eup %1499 }
 0x27e   :  { %1100 = vmatpush.bf16.msra.mxu2 %v1091_v51  ;;  %834 = vadd.xlane.f32.xlu1 %v833_v21  ;;  %v842_v4 = vsel %vm703_vm1, %v1926_v47, 0.0 }
 0x27f   :  { %846 = vadd.xlane.f32.xlu2 %v845_v22 }
 0x282   :  { %396 = vrot.lane.b32.xlu0 %v1721_v55, %s1635_s2 }
 0x286   :  { %843 = vadd.xlane.f32.xlu1 %v842_v4 }
 0x28a   :  { %392 = vrot.lane.b32.xlu0 %v1710_v50, %s1635_s2 }
 0x291   :  { %v814_v13 = vpop.xlane.xlu0 %813 }
 0x292   :  { %1501 = vrcp.f32 %v814_v13 }
 0x297   :  { %394 = vrot.lane.b32.xlu2 %v1698_v46, %s1635_s2 }
 0x298   :  { %v1502_v23 = vpop.eup %1501 }
 0x299   :  { %v868_v24 = vmul.f32 %v1502_v23, %v1855_v60 }
 0x29b   :  { %v884_v25 = vpack.c.bf16 %v868_v24, %v868_v24 }
 0x29d   :  { %1411 = vmatmul.msk.bf16.vlgmr.msrb.gmra.mxu0 %vm703_vm1, %v884_v25 }
 0x29f   :  { %390 = vrot.lane.b32.xlu1 %v1704_v48, %s1635_s2 }
 0x2bd   :  { %v1940_v55 = vpop.f32.mrf.mxu0 }
 0x2c1   :  { %v817_v27 = vpop.xlane.xlu1 %816 }
 0x2c2   :  { %1503 = vrcp.f32 %v817_v27 }
 0x2c5   :  { %v914_v28 = vpop.f32.mrf.mxu0 }
 0x2c8   :  { %v1504_v50 = vpop.eup %1503 }
 0x2c9   :  { %v869_v11 = vmul.f32 %v1504_v50, %v1864_v14 }
 0x2cb   :  { %v885_v12 = vpack.c.bf16 %v869_v11, %v869_v11 }
 0x2cd   :  { %1412 = vmatmul.msk.bf16.vlgmr.msrb.gmra.mxu1 %vm703_vm1, %v885_v12 }
 0x2d1   :  { %v826_v46 = vpop.xlane.xlu0 %825 }
 0x2d2   :  { %v829_v32 = vpop.xlane.xlu2 %828  ;;  %1505 = vrcp.f32 %v826_v46 }
 0x2d3   :  { %1507 = vrcp.f32 %v829_v32 }
 0x2d8   :  { %v1506_v60 = vpop.eup %1505 }
 0x2d9   :  { %v1508_v0 = vpop.eup %1507  ;;  %v872_v33 = vmul.f32 %v1506_v60, %v1872_v26  ;;  %v820_v48 = vpop.xlane.xlu1 %819 }
 0x2da   :  { %v873_v2 = vmul.f32 %v1508_v0, %v1874_v30  ;;  %1509 = vrcp.f32 %v820_v48  ;;  %v823_v35 = vpop.xlane.xlu2 %822 }
 0x2db   :  { %v888_v38 = vpack.c.bf16 %v872_v33, %v872_v33  ;;  %1511 = vrcp.f32 %v823_v35 }
 0x2dc   :  { %v889_v40 = vpack.c.bf16 %v873_v2, %v873_v2 }
 0x2dd   :  { %1415 = vmatmul.msk.bf16.vlgmr.msra.gmra.mxu0 %vm703_vm1, %v888_v38 }
 0x2de   :  { %1416 = vmatmul.msk.bf16.vlgmr.msra.gmra.mxu1 %vm703_vm1, %v889_v40 }
 0x2e0   :  { %v1510_v14 = vpop.eup %1509 }
 0x2e1   :  { %v1512_v29 = vpop.eup %1511  ;;  %v870_v42 = vmul.f32 %v1510_v14, %v1882_v36  ;;  %v838_v52 = vpop.xlane.xlu0 %837 }
 0x2e2   :  { %v871_v44 = vmul.f32 %v1512_v29, %v1884_v41  ;;  %v832_v26 = vpop.xlane.xlu2 %831 }
 0x2e3   :  { %v886_v34 = vpack.c.bf16 %v870_v42, %v870_v42  ;;  %1513 = vrcp.f32 %v832_v26 }
 0x2e4   :  { %v887_v6 = vpack.c.bf16 %v871_v44, %v871_v44 }
 0x2e5   :  { %1413 = vmatmul.msk.bf16.vlgmr.msrb.gmra.mxu2 %vm703_vm1, %v886_v34 }
 0x2e6   :  { %1414 = vmatmul.msk.bf16.vlgmr.msra.gmra.mxu3 %vm703_vm1, %v887_v6 }
 0x2e9   :  { %v841_v30 = vpop.xlane.xlu1 %840  ;;  %v1514_v45 = vpop.eup %1513 }
 0x2ea   :  { %v874_v53 = vmul.f32 %v1514_v45, %v1894_v56  ;;  %1515 = vrcp.f32 %v841_v30 }
 0x2ec   :  { %v890_v41 = vpack.c.bf16 %v874_v53, %v874_v53 }
 0x2f0   :  { %v1516_v1 = vpop.eup %1515 }
 0x2f1   :  { %v835_v57 = vpop.xlane.xlu1 %834  ;;  %v877_v54 = vmul.f32 %v1516_v1, %v1906_v16 }
 0x2f2   :  { %1517 = vrcp.f32 %v835_v57  ;;  %v847_v59 = vpop.xlane.xlu2 %846  ;;  %v1953_v36 = vpop.f32.mrf.mxu1 }
 0x2f3   :  { %v893_v15 = vpack.c.bf16 %v877_v54, %v877_v54 }
 0x2f4   :  { %v397_v61 = vpop.permute.xlu0 %396 }
 0x2f5   :  { %v1186_v63 = vsel %vm899_vm2, %v397_v61, 0  ;;  %1417 = vmatmul.msk.bf16.vlgmr.msra.gmra.mxu2 %vm703_vm1, %v890_v41 }
 0x2f6   :  { %v1957_v43 = vpop.f32.mrf.mxu3  ;;  %1195 = vmatpush.bf16.msra.mxu3 %v1186_v63 }
 0x2f8   :  { %v1518_v5 = vpop.eup %1517 }
 0x2f9   :  { %v875_v9 = vmul.f32 %v1518_v5, %v1915_v58  ;;  %v844_v56 = vpop.xlane.xlu1 %843 }
 0x2fa   :  { %1519 = vrcp.f32 %v844_v56  ;;  %v395_v3 = vpop.permute.xlu2 %394  ;;  %v933_v7 = vpop.f32.mrf.mxu1 }
 0x2fb   :  { %v891_v8 = vpack.c.bf16 %v875_v9, %v875_v9  ;;  %v1167_v10 = vsel %vm899_vm2, %v395_v3, 0  ;;  %1521 = vrcp.f32 %v847_v59 }
 0x2fc   :  { %1176 = vmatpush.bf16.msrb.mxu2 %v1167_v10  ;;  %v393_v37 = vpop.permute.xlu0 %392  ;;  %1523 = vrcp.f32 %v838_v52 }
 0x2fd   :  { %v1148_v18 = vsel %vm899_vm2, %v393_v37, 0  ;;  %1418 = vmatmul.msk.bf16.vlgmr.msrb.gmra.mxu3 %vm703_vm1, %v891_v8 }
 0x2fe   :  { %v971_v39 = vpop.f32.mrf.mxu3  ;;  %1157 = vmatpush.bf16.msrb.mxu1 %v1148_v18 }
 0x300   :  { %v1520_v17 = vpop.eup %1519  ;;  %v1964_v62 = vpop.f32.mrf.mxu2 }
 0x301   :  { %v878_v19 = vmul.f32 %v1520_v17, %v1926_v47  ;;  %1420 = vmatmul.msk.bf16.vlgmr.msrb.gmra.mxu1 %vm703_vm1, %v893_v15  ;;  %v1522_v58 = vpop.eup %1521 }
 0x302   :  { %v879_v31 = vmul.f32 %v1522_v58, %v1917_v20  ;;  %v1524_v22 = vpop.eup %1523 }
 0x303   :  { %v894_v16 = vpack.c.bf16 %v878_v19, %v878_v19  ;;  %v876_v4 = vmul.f32 %v1524_v22, %v1891_v49 }
 0x304   :  { %v895_v21 = vpack.c.bf16 %v879_v31, %v879_v31 }
 0x305   :  { %1421 = vmatmul.msk.bf16.vlgmr.msrb.gmra.mxu2 %vm703_vm1, %v894_v16  ;;  %v892_v47 = vpack.c.bf16 %v876_v4, %v876_v4 }
 0x308   :  { %v952_v51 = vpop.f32.mrf.mxu2 }
 0x30d   :  { %1422 = vmatmul.msk.bf16.vlgmr.msra.gmra.mxu3 %vm703_vm1, %v895_v21 }
 0x311   :  { %v391_v13 = vpop.permute.xlu1 %390 }
 0x312   :  { %v1129_v23 = vsel %vm899_vm2, %v391_v13, 0 }
 0x313   :  { %1138 = vmatpush.bf16.msrb.mxu0 %v1129_v23 }
 0x316   :  { %1419 = vmatmul.msk.bf16.vlgmr.msrb.gmra.mxu0 %vm703_vm1, %v892_v47 }
 0x31a   :  { %v988_v24 = vpop.f32.mrf.mxu0 }
 0x31b   :  { %1205 = vrot.lane.b32.xlu2 %v988_v24, %s1635_s2 }
 0x322   :  { %v990_v25 = vpop.f32.mrf.mxu0 }
 0x34a   :  { %v1007_v27 = vpop.f32.mrf.mxu1 }
 0x34b   :  { %1207 = vrot.lane.b32.xlu1 %v1007_v27, %s1635_s2 }
 0x352   :  { %v1009_v20 = vpop.f32.mrf.mxu1 }
 0x35a   :  { %v1064_v28 = vpop.f32.mrf.mxu0 }
 0x35b   :  { %v1083_v50 = vpop.f32.mrf.mxu1  ;;  %1221 = vrot.lane.b32.xlu1 %v1064_v28, %s1631_s24 }
 0x35c   :  { %1223 = vrot.lane.b32.xlu0 %v1083_v50, %s1631_s24 }
 0x362   :  { %v1066_v49 = vpop.f32.mrf.mxu0 }
 0x363   :  { %v1085_v11 = vpop.f32.mrf.mxu1 }
 0x368   :  { %v1026_v12 = vpop.f32.mrf.mxu2 }
 0x369   :  { %v1045_v46 = vpop.f32.mrf.mxu3  ;;  %1209 = vrot.lane.b32.xlu0 %v1026_v12, %s1635_s2 }
 0x36a   :  { %1211 = vrot.lane.b32.xlu2 %v1045_v46, %s1635_s2 }
 0x370   :  { %v1028_v32 = vpop.f32.mrf.mxu2 }
 0x371   :  { %v1047_v60 = vpop.f32.mrf.mxu3 }
 0x375   :  { %v1206_v26 = vpop.permute.xlu2 %1205 }
 0x378   :  { %v1102_v0 = vpop.f32.mrf.mxu2 }
 0x379   :  { %1225 = vrot.lane.b32.xlu2 %v1102_v0, %s1631_s24 }
 0x37e   :  { %v1159_v33 = vpop.f32.mrf.mxu1 }
 0x380   :  { %v1104_v48 = vpop.f32.mrf.mxu2  ;;  %v1121_v2 = vpop.f32.mrf.mxu3 }
 0x381   :  { %1239 = vrot.lane.b32.xlu2 %v1159_v33, %s1634_s0  ;;  %1227 = vrot.lane.b32.xlu1 %v1121_v2, %s1631_s24 }
 0x386   :  { %v1161_v35 = vpop.f32.mrf.mxu1 }
 0x388   :  { %v1123_v38 = vpop.f32.mrf.mxu3  ;;  %v1178_v40 = vpop.f32.mrf.mxu2 }
 0x389   :  { %1241 = vrot.lane.b32.xlu1 %v1178_v40, %s1634_s0 }
 0x390   :  { %v1180_v14 = vpop.f32.mrf.mxu2  ;;  %v1197_v29 = vpop.f32.mrf.mxu3 }
 0x393   :  { %v1140_v42 = vpop.f32.mrf.mxu0 }
 0x394   :  { %1237 = vrot.lane.b32.xlu0 %v1140_v42, %s1634_s0 }
 0x398   :  { %v1199_v44 = vpop.f32.mrf.mxu3 }
 0x39b   :  { %v1142_v34 = vpop.f32.mrf.mxu0 }
 0x39c   :  { %1243 = vrot.lane.b32.xlu0 %v1197_v29, %s1634_s0 }
 0x3bd   :  { %v1208_v45 = vpop.permute.xlu1 %1207 }
 0x3be   :  { %v1250_v53 = vsel %vm398_vm0, %v1953_v36, %v1208_v45  ;;  %v1249_v36 = vsel %vm398_vm0, %v1940_v55, %v1206_v26 }
 0x3c4   :  { %v1212_v6 = vpop.permute.xlu2 %1211 }
 0x3c5   :  { %v1252_v10 = vsel %vm398_vm0, %v1957_v43, %v1212_v6 }
 0x3cd   :  { %v1222_v61 = vpop.permute.xlu1 %1221 }
 0x3ce   :  { %v1224_v52 = vpop.permute.xlu0 %1223  ;;  %v1254_v7 = vsel %vm1253_vm3, %v1249_v36, %v1222_v61 }
 0x3cf   :  { %v1255_v57 = vsel %vm1253_vm3, %v1250_v53, %v1224_v52 }
 0x3d3   :  { %v1226_v30 = vpop.permute.xlu2 %1225 }
 0x3db   :  { %v1240_v59 = vpop.permute.xlu2 %1239  ;;  %v1210_v1 = vpop.permute.xlu0 %1209 }
 0x3dc   :  { %v1260_v41 = vsel %vm1258_vm4, %v1255_v57, %v1240_v59  ;;  %v1251_v5 = vsel %vm398_vm0, %v1964_v62, %v1210_v1 }
 0x3dd   :  { %1264 = vst [vmem:[#allocation8 + $0x8] sm:$0xff] %v1260_v41  ;;  %v1256_v9 = vsel %vm1253_vm3, %v1251_v5, %v1226_v30 }
 0x3f3   :  { %v1228_v63 = vpop.permute.xlu1 %1227 }
 0x3f4   :  { %v1257_v37 = vsel %vm1253_vm3, %v1252_v10, %v1228_v63 }
 0x3fb   :  { %v1242_v56 = vpop.permute.xlu1 %1241 }
 0x3fc   :  { %v1261_v3 = vsel %vm1258_vm4, %v1256_v9, %v1242_v56 }
 0x3fd   :  { %1265 = vst [vmem:[#allocation8 + $0x10] sm:$0xff] %v1261_v3 }
 0x406   :  { %v1238_v54 = vpop.permute.xlu0 %1237 }
 0x407   :  { %v1259_v8 = vsel %vm1258_vm4, %v1254_v7, %v1238_v54 }
 0x408   :  { %1263 = vst [vmem:[#allocation8] sm:$0xff] %v1259_v8 }
 0x40e   :  { %v1244_v55 = vpop.permute.xlu0 %1243 }
 0x40f   :  { %v1262_v18 = vsel %vm1258_vm4, %v1257_v37, %v1244_v55 }
 0x410   :  { %1266 = vst [vmem:[#allocation8 + $0x18] sm:$0xff] %v1262_v18 }
 0x411   :  { %1279 = dma.vmem_to_hbm [thread:$0]  %s1272_s4, 512, %s1274_s7, [#allocation4], %s1637_s8, %s1637_s8, %s1638_s9  }
 0x412   :  { %1625 = dma.done.wait [#allocation4], 512  }
 0x413   :  { %1626 = vsyncadd [#allocation4], 4294966784 }
 0x414   :  { %1284 = vsyncpa [#allocation3], 1 }
 0x415   :  { %1285 = vsyncpa [#allocation6], 1 }
 0x416   :  { %1286 = vsyncpa [#allocation4], 1 }

</bundles_post_ra>
